<compile_context>
chip_gen: v5e
topology: v5e:2x2
jax: 0.10.0
libtpu: 0.0.40
codegen_flags: <defaults>
</compile_context>

<pallas_src>
import functools
import math

import jax
import jax.numpy as jnp
from jax.experimental import pallas as pl
from jax.experimental.pallas import tpu as pltpu


def _round_up(x, m):
    return ((x + m - 1) // m) * m


def _rule_embed_kernel(*refs, num_rules, gather_in_kernel, angle_scale):
    it = iter(refs)
    if gather_in_kernel:
        tok_ref = next(it)      # (TN, 1) int32 token ids
        a_tab_ref = next(it)    # (V, F)  full a_n table (VMEM resident)
        b_tab_ref = next(it)    # (V, F)  full b_n table (VMEM resident)
    else:
        x_ref = next(it)        # (TN, 1) f32, pre-scaled 2*pi*token/vocab
        a_ref = next(it)        # (TN, F) gathered a_n rows
        b_ref = next(it)        # (TN, F) gathered b_n rows
    ridx_ref = next(it) if num_rules > 1 else None   # (TN, 1) int32
    freq_ref = next(it)         # (1, F)   fourier frequencies
    w_ref = next(it)            # (R, F, D) fused proj_w.T @ rule_transform[r]
    bias_ref = next(it)         # (R, 1, D) fused proj_b  @ rule_transform[r]
    out_ref = next(it)          # (TN, D)

    if gather_in_kernel:
        tok = tok_ref[...]                                        # (TN, 1)
        x = tok.astype(jnp.float32) * angle_scale                 # (TN, 1)
        tn = out_ref.shape[0]
        v = a_tab_ref.shape[0]
        # One-hot MXU gather from the VMEM-resident tables (exact, robust).
        onehot = (jax.lax.broadcasted_iota(jnp.int32, (tn, v), 1)
                  == tok).astype(jnp.float32)                     # (TN, V)
        a = jnp.dot(onehot, a_tab_ref[...],
                    preferred_element_type=jnp.float32)           # (TN, F)
        b = jnp.dot(onehot, b_tab_ref[...],
                    preferred_element_type=jnp.float32)           # (TN, F)
    else:
        x = x_ref[...]
        a = a_ref[...]
        b = b_ref[...]

    ang = x * freq_ref[...]                                       # (TN, F)
    fourier = a * jnp.cos(ang) + b * jnp.sin(ang)                 # (TN, F)

    if num_rules == 1:
        # token_rules must all be 0 when R == 1 (randint(0,1) in the module).
        out_ref[...] = (jnp.dot(fourier, w_ref[0],
                                preferred_element_type=jnp.float32)
                        + bias_ref[0])
    else:
        # Per-rule fused matmul + per-token mask select.  NOTE: a rule index
        # outside [0, R) yields an all-zero row (invalid data only).
        ridx = ridx_ref[...]                                      # (TN, 1)
        acc = jnp.zeros(out_ref.shape, jnp.float32)
        for r in range(num_rules):
            y = (jnp.dot(fourier, w_ref[r],
                         preferred_element_type=jnp.float32)
                 + bias_ref[r])                                   # (TN, D)
            acc = acc + jnp.where(ridx == r, y, 0.0)
        out_ref[...] = acc


def dynamic_rule_embedding(token_ids, params, *, tile_n=2048,
                           max_vocab_in_vmem=128):
    vocab_size = params["vocab_size"]
    a_n = params["a_n"]                        # (V, F)
    b_n = params["b_n"]                        # (V, F)
    freqs = params["fourier_freqs"]            # (1, F)
    proj_w = params["proj_w"]                  # (D, F)  torch Linear layout
    proj_b = params["proj_b"]                  # (D,)
    rule_transform = params["rule_transform"]  # (R, D, D)
    token_rules = params["token_rules"]        # (V,) int32

    B, S = token_ids.shape
    F = a_n.shape[1]
    D = proj_w.shape[0]
    R = rule_transform.shape[0]
    N = B * S

    # ---- tile sizing: big tiles amortize ~0.35us/step overhead; cap at the
    # padded row count; guarantee >=2 grid steps (v7x has 2 TCs) when possible.
    n8 = _round_up(N, 8)
    tile = max(8, min(_round_up(tile_n, 8), n8))
    if tile == n8 and n8 >= 16:
        tile = _round_up(n8 // 2, 8)
    Np = _round_up(N, tile)
    grid = (Np // tile,)

    tok = token_ids.reshape(N).astype(jnp.int32)
    if Np != N:
        tok = jnp.pad(tok, (0, Np - N))        # pad with token id 0 (valid)

    # ---- glue: fuse projection into rule matrices (pure algebra, hoisted) --
    # out = fourier @ (proj_w.T @ R_r) + proj_b @ R_r
    w_fused = jnp.einsum('df,rde->rfe', proj_w, rule_transform)    # (R, F, D)
    b_fused = jnp.einsum('d,rde->re', proj_b,
                         rule_transform).reshape(R, 1, D)          # (R, 1, D)

    # exact as long as token ids are representable in f32 (vocab < 2**24)
    angle_scale = 2.0 * math.pi / vocab_size
    gather_in_kernel = vocab_size <= max_vocab_in_vmem

    inputs, in_specs = [], []
    if gather_in_kernel:
        inputs += [tok.reshape(Np, 1), a_n, b_n]
        in_specs += [
            pl.BlockSpec((tile, 1), lambda i: (i, 0)),            # token ids
            pl.BlockSpec((vocab_size, F), lambda i: (0, 0)),      # a_n table
            pl.BlockSpec((vocab_size, F), lambda i: (0, 0)),      # b_n table
        ]
    else:
        x = (tok.astype(jnp.float32) * angle_scale).reshape(Np, 1)
        a_g = jnp.take(a_n, tok, axis=0)
        b_g = jnp.take(b_n, tok, axis=0)
        inputs += [x, a_g, b_g]
        in_specs += [
            pl.BlockSpec((tile, 1), lambda i: (i, 0)),            # scaled tok
            pl.BlockSpec((tile, F), lambda i: (i, 0)),            # a gathered
            pl.BlockSpec((tile, F), lambda i: (i, 0)),            # b gathered
        ]
    if R > 1:
        ridx = jnp.take(token_rules, tok, axis=0).astype(jnp.int32)
        inputs += [ridx.reshape(Np, 1)]
        in_specs += [pl.BlockSpec((tile, 1), lambda i: (i, 0))]
    inputs += [freqs, w_fused, b_fused]
    in_specs += [
        pl.BlockSpec((1, F), lambda i: (0, 0)),                   # freqs
        pl.BlockSpec((R, F, D), lambda i: (0, 0, 0)),             # fused W
        pl.BlockSpec((R, 1, D), lambda i: (0, 0, 0)),             # fused bias
    ]

    flops = 2 * Np * F * D * R
    if gather_in_kernel:
        flops += 2 * 2 * Np * vocab_size * F
        bytes_in = 4 * (Np + 2 * vocab_size * F)
    else:
        bytes_in = 4 * (Np + 2 * Np * F)
    cost = pl.CostEstimate(
        flops=flops,
        transcendentals=2 * Np * F,
        bytes_accessed=bytes_in + 4 * (F + R * F * D + R * D + Np * D
                                       + (Np if R > 1 else 0)),
    )

    kernel = functools.partial(_rule_embed_kernel, num_rules=R,
                               gather_in_kernel=gather_in_kernel,
                               angle_scale=angle_scale)
    out = pl.pallas_call(
        kernel,
        out_shape=jax.ShapeDtypeStruct((Np, D), jnp.float32),
        grid=grid,
        in_specs=in_specs,
        out_specs=pl.BlockSpec((tile, D), lambda i: (i, 0)),
        compiler_params=pltpu.CompilerParams(
            dimension_semantics=("parallel",),
            vmem_limit_bytes=32 * 1024 * 1024),
        cost_estimate=cost,
    )(*inputs)
    return out[:N].reshape(B, S, D)


def _reference(token_ids, params):
    """Pure-JAX reference mirroring the PyTorch forward exactly."""
    V = params["vocab_size"]
    x = token_ids.astype(jnp.float32)[..., None] / V                 # (B,S,1)
    freqs = params["fourier_freqs"]                                   # (1,F)
    ang = 2.0 * jnp.pi * freqs * x                                    # (B,S,F)
    cos_t, sin_t = jnp.cos(ang), jnp.sin(ang)
    a_g = params["a_n"][token_ids]
    b_g = params["b_n"][token_ids]
    fourier = a_g * cos_t + b_g * sin_t                               # (B,S,F)
    base = fourier @ params["proj_w"].T + params["proj_b"]            # (B,S,D)
    rule_idx = params["token_rules"][token_ids]                       # (B,S)
    rule_m = params["rule_transform"][rule_idx]                       # (B,S,D,D)
    return jnp.einsum('bsd,bsde->bse', base, rule_m)


def make_params(key, vocab_size, embedding_dim, num_frequencies, num_rules=1):
    ks = jax.random.split(key, 6)
    freqs = jnp.linspace(1.0, num_frequencies, num_frequencies,
                         dtype=jnp.float32).reshape(1, -1)
    a_n = jax.random.normal(ks[0], (vocab_size, num_frequencies), jnp.float32)
    b_n = jax.random.normal(ks[1], (vocab_size, num_frequencies), jnp.float32)
    rule_transform = jax.random.normal(
        ks[2], (num_rules, embedding_dim, embedding_dim), jnp.float32)
    if num_rules == 1:
        # torch.randint(0, 1, ...) is identically zero
        token_rules = jnp.zeros((vocab_size,), jnp.int32)
    else:
        token_rules = jax.random.randint(ks[5], (vocab_size,), 0, num_rules,
                                         dtype=jnp.int32)
    bound = 1.0 / math.sqrt(num_frequencies)
    proj_w = jax.random.uniform(ks[3], (embedding_dim, num_frequencies),
                                jnp.float32, -bound, bound)
    proj_b = jax.random.uniform(ks[4], (embedding_dim,),
                                jnp.float32, -bound, bound)
    return dict(vocab_size=vocab_size, fourier_freqs=freqs, a_n=a_n, b_n=b_n,
                rule_transform=rule_transform, token_rules=token_rules,
                proj_w=proj_w, proj_b=proj_b)


def _check(token_ids, params):
    out = jax.block_until_ready(dynamic_rule_embedding(token_ids, params))
    ref = _reference(token_ids, params)
    assert out.shape == ref.shape
    assert jnp.allclose(out, ref, atol=1e-4, rtol=1e-4), (
        float(jnp.max(jnp.abs(out - ref))))


if __name__ == "__main__":
    key = jax.random.PRNGKey(0)

    # Test 1: module-spec shapes (small vocab -> in-kernel one-hot gather).
    k1, k2, k3, k4, k5, k6 = jax.random.split(key, 6)
    params = make_params(k1, vocab_size=32, embedding_dim=32,
                         num_frequencies=16)
    token_ids = jax.random.randint(k2, (2, 8), 0, 32, dtype=jnp.int32)
    _check(token_ids, params)

    # Test 2: larger vocab -> glue-gather fallback path, multi-step grid.
    params2 = make_params(k3, vocab_size=200, embedding_dim=32,
                          num_frequencies=16)
    token_ids2 = jax.random.randint(k4, (4, 40), 0, 200, dtype=jnp.int32)
    _check(token_ids2, params2)

    # Test 3: multi-rule path (as produced by add_new_rule).
    params3 = make_params(k5, vocab_size=32, embedding_dim=32,
                          num_frequencies=16, num_rules=3)
    token_ids3 = jax.random.randint(k6, (2, 16), 0, 32, dtype=jnp.int32)
    _check(token_ids3, params3)

    print("KERNEL_OK")
</pallas_src>

<mosaic_0001>
module attributes {stable_mosaic.version = 11 : i64} {
  func.func @_rule_embed_kernel(%arg0: i32, %arg1: memref<8x1xi32, #tpu.memory_space<vmem>>, %arg2: memref<32x16xf32, #tpu.memory_space<vmem>>, %arg3: memref<32x16xf32, #tpu.memory_space<vmem>>, %arg4: memref<1x16xf32, #tpu.memory_space<vmem>>, %arg5: memref<1x16x32xf32, #tpu.memory_space<vmem>>, %arg6: memref<1x1x32xf32, #tpu.memory_space<vmem>>, %arg7: memref<8x32xf32, #tpu.memory_space<vmem>>) attributes {dimension_semantics = [#tpu.dimension_semantics<parallel>], iteration_bounds = array<i64: 2>, scalar_prefetch = 0 : i64, scratch_operands = 0 : i64, tpu.core_type = #tpu.core_type<tc>, window_params = [{transform_indices = @transform_0, window_bounds = array<i64: 8, 1>}, {pipeline_mode = #tpu.pipeline_mode<synchronous>, transform_indices = @transform_1, window_bounds = array<i64: 32, 16>}, {pipeline_mode = #tpu.pipeline_mode<synchronous>, transform_indices = @transform_2, window_bounds = array<i64: 32, 16>}, {pipeline_mode = #tpu.pipeline_mode<synchronous>, transform_indices = @transform_3, window_bounds = array<i64: 1, 16>}, {pipeline_mode = #tpu.pipeline_mode<synchronous>, transform_indices = @transform_4, window_bounds = array<i64: 1, 16, 32>}, {pipeline_mode = #tpu.pipeline_mode<synchronous>, transform_indices = @transform_5, window_bounds = array<i64: 1, 1, 32>}, {transform_indices = @transform_6, window_bounds = array<i64: 8, 32>}]} {
    %c0 = arith.constant 0 : index
    %c0_0 = arith.constant 0 : index
    %0 = vector.load %arg1[%c0, %c0_0] : memref<8x1xi32, #tpu.memory_space<vmem>>, vector<8x1xi32>
    %1 = arith.sitofp %0 : vector<8x1xi32> to vector<8x1xf32>
    %cst = arith.constant 0.196349546 : f32
    %2 = vector.broadcast %cst : f32 to vector<8x1xf32>
    %3 = arith.mulf %1, %2 : vector<8x1xf32>
    %4 = tpu.iota {dimensions = array<i32: 1>} : vector<8x32xi32>
    %5 = vector.broadcast %0 : vector<8x1xi32> to vector<8x32xi32>
    %6 = arith.cmpi eq, %4, %5 : vector<8x32xi32>
    %7 = arith.extui %6 : vector<8x32xi1> to vector<8x32xi32>
    %8 = arith.sitofp %7 : vector<8x32xi32> to vector<8x32xf32>
    %c0_1 = arith.constant 0 : index
    %c0_2 = arith.constant 0 : index
    %9 = vector.load %arg2[%c0_1, %c0_2] : memref<32x16xf32, #tpu.memory_space<vmem>>, vector<32x16xf32>
    %cst_3 = arith.constant dense<0.000000e+00> : vector<8x16xf32>
    %10 = tpu.matmul %8, %9, %cst_3 {dimension_numbers = #tpu.dot_dimension_numbers<[1], [0], [0], [1], [0, 0, 1, 1], [], []>} : vector<8x32xf32>, vector<32x16xf32>, vector<8x16xf32> -> vector<8x16xf32>
    %c0_4 = arith.constant 0 : index
    %c0_5 = arith.constant 0 : index
    %11 = vector.load %arg3[%c0_4, %c0_5] : memref<32x16xf32, #tpu.memory_space<vmem>>, vector<32x16xf32>
    %cst_6 = arith.constant dense<0.000000e+00> : vector<8x16xf32>
    %12 = tpu.matmul %8, %11, %cst_6 {dimension_numbers = #tpu.dot_dimension_numbers<[1], [0], [0], [1], [0, 0, 1, 1], [], []>} : vector<8x32xf32>, vector<32x16xf32>, vector<8x16xf32> -> vector<8x16xf32>
    %c0_7 = arith.constant 0 : index
    %c0_8 = arith.constant 0 : index
    %13 = vector.load %arg4[%c0_7, %c0_8] : memref<1x16xf32, #tpu.memory_space<vmem>>, vector<1x16xf32>
    %14 = vector.broadcast %3 : vector<8x1xf32> to vector<8x16xf32>
    %15 = vector.broadcast %13 : vector<1x16xf32> to vector<8x16xf32>
    %16 = arith.mulf %14, %15 : vector<8x16xf32>
    %17 = math.cos %16 : vector<8x16xf32>
    %18 = arith.mulf %10, %17 : vector<8x16xf32>
    %19 = math.sin %16 : vector<8x16xf32>
    %20 = arith.mulf %12, %19 : vector<8x16xf32>
    %21 = arith.addf %18, %20 : vector<8x16xf32>
    %c0_9 = arith.constant 0 : index
    %c0_10 = arith.constant 0 : index
    %c0_11 = arith.constant 0 : index
    %22 = vector.load %arg5[%c0_9, %c0_10, %c0_11] : memref<1x16x32xf32, #tpu.memory_space<vmem>>, vector<1x16x32xf32>
    %23 = vector.shape_cast %22 : vector<1x16x32xf32> to vector<16x32xf32>
    %cst_12 = arith.constant dense<0.000000e+00> : vector<8x32xf32>
    %24 = tpu.matmul %21, %23, %cst_12 {dimension_numbers = #tpu.dot_dimension_numbers<[1], [0], [0], [1], [0, 0, 1, 1], [], []>} : vector<8x16xf32>, vector<16x32xf32>, vector<8x32xf32> -> vector<8x32xf32>
    %c0_13 = arith.constant 0 : index
    %c0_14 = arith.constant 0 : index
    %c0_15 = arith.constant 0 : index
    %25 = vector.load %arg6[%c0_13, %c0_14, %c0_15] : memref<1x1x32xf32, #tpu.memory_space<vmem>>, vector<1x1x32xf32>
    %26 = vector.shape_cast %25 : vector<1x1x32xf32> to vector<1x32xf32>
    %27 = vector.broadcast %26 : vector<1x32xf32> to vector<8x32xf32>
    %28 = arith.addf %24, %27 : vector<8x32xf32>
    %c0_16 = arith.constant 0 : index
    %c0_17 = arith.constant 0 : index
    %29 = vector.load %arg7[%c0_16, %c0_17] : memref<8x32xf32, #tpu.memory_space<vmem>>, vector<8x32xf32>
    tpu.vector_store %arg7[%c0_16, %c0_17], %28 {strides = array<i32>} : memref<8x32xf32, #tpu.memory_space<vmem>>, vector<8x32xf32>,
    return
  }
  func.func @transform_0(%arg0: i32) -> (i32, i32) {
    %c0_i32 = arith.constant 0 : i32
    %c0_i32_0 = arith.constant 0 : i32
    return %arg0, %c0_i32 : i32, i32
  }
  func.func @transform_1(%arg0: i32) -> (i32, i32) {
    %c0_i32 = arith.constant 0 : i32
    %c0_i32_0 = arith.constant 0 : i32
    %c0_i32_1 = arith.constant 0 : i32
    return %c0_i32, %c0_i32_0 : i32, i32
  }
  func.func @transform_2(%arg0: i32) -> (i32, i32) {
    %c0_i32 = arith.constant 0 : i32
    %c0_i32_0 = arith.constant 0 : i32
    %c0_i32_1 = arith.constant 0 : i32
    return %c0_i32, %c0_i32_0 : i32, i32
  }
  func.func @transform_3(%arg0: i32) -> (i32, i32) {
    %c0_i32 = arith.constant 0 : i32
    %c0_i32_0 = arith.constant 0 : i32
    %c0_i32_1 = arith.constant 0 : i32
    return %c0_i32, %c0_i32_0 : i32, i32
  }
  func.func @transform_4(%arg0: i32) -> (i32, i32, i32) {
    %c0_i32 = arith.constant 0 : i32
    %c0_i32_0 = arith.constant 0 : i32
    %c0_i32_1 = arith.constant 0 : i32
    %c0_i32_2 = arith.constant 0 : i32
    return %c0_i32, %c0_i32_0, %c0_i32_1 : i32, i32, i32
  }
  func.func @transform_5(%arg0: i32) -> (i32, i32, i32) {
    %c0_i32 = arith.constant 0 : i32
    %c0_i32_0 = arith.constant 0 : i32
    %c0_i32_1 = arith.constant 0 : i32
    %c0_i32_2 = arith.constant 0 : i32
    return %c0_i32, %c0_i32_0, %c0_i32_1 : i32, i32, i32
  }
  func.func @transform_6(%arg0: i32) -> (i32, i32) {
    %c0_i32 = arith.constant 0 : i32
    %c0_i32_0 = arith.constant 0 : i32
    return %arg0, %c0_i32 : i32, i32
  }
}

</mosaic_0001>

<bundles_post_ra>
// kernel: tpu_custom_call.1
= control target key start
LH: loop header
LB: loop body
LE: loop exit
PB: predicated region body
PF: predicated region fallthrough
CT: control target
= control target key end

     0   :  { %11 = vsyncpa [#allocation3], 0  ;;  %s1102_s0 = inlined_call_operand.vmem [shape: s32[16,1], index: 0, kind: input, shape index: {}]   ;;  %s1103_s1 = inlined_call_operand.vmem [shape: f32[32,16], index: 1, kind: input, shape index: {}]   ;;  %s1104_s2 = inlined_call_operand.vmem [shape: f32[32,16], index: 2, kind: input, shape index: {}]   ;;  %s1105_s3 = inlined_call_operand.vmem [shape: f32[1,16], index: 3, kind: input, shape index: {}]   ;;  %s1106_s4 = inlined_call_operand.vmem [shape: f32[1,16,32], index: 4, kind: input, shape index: {}]   ;;  %s1107_s5 = inlined_call_operand.vmem [shape: f32[1,1,32], index: 5, kind: input, shape index: {}]   ;;  %s1108_s6 = inlined_call_operand.hbm [shape: f32[16,32], index: 6, kind: output, shape index: {}]  }
   0x1   :  { %13 = vsyncpa [#allocation3 + $0x1], 0  ;;  %s915_s21 = smov 0   ;;  %s917_s22 = smov 0  }
   0x2   :  { %s919_s23 = smov 0   ;;  %s921_s24 = smov 0  }
   0x3 LB: > { %s936_s25 = sadd.s32 4294967295, %s870_s24   ;;  %s738_s26 = sadd.s32 4294967294, %s870_s24   ;;  %s870_s24 = sphi %s921_s24, %s1116_s24   ;;  %s866_s23 = sphi %s919_s23, %s1115_s23   ;;  %s862_s22 = sphi %s917_s22, %s1114_s22   ;;  %s858_s21 = sphi %s915_s21, %s1113_s21  }
   0x4   : > { %s940_s27 = sadd.s32 1, %s870_s24   ;;  %s157_s28 = sadd.s32 1, %s866_s23 }
   0x5   : > { %s154_s29 = ssub.s32 %s870_s24, %s940_s27  ;;  %p167_p0 = scmp.ne.s32.totalorder %s866_s23, %s862_s22 }
   0x6   : > { %p155_p1 = scmp.eq.s32.totalorder %s154_s29, 0  ;;  %p168_p2 = scmp.eq.s32.totalorder %s936_s25, 1 }
   0x7   : > { %p173_p3 = scmp.ne.s32.totalorder %s862_s22, %s858_s21  ;;  %p174_p4 = scmp.eq.s32.totalorder %s738_s26, 1 }
   0x8   : > { %s951_s30 = scalar_select %p155_p1, %s866_s23, %s157_s28  }
   0x9   : > { %p953_p5 = por %p168_p2, %p167_p0  ;;  %p957_p6 = por %p174_p4, %p173_p3 }
   0xa   : > { %p741_p7 = scmp.ge.s32.totalorder %s870_s24, 1  ;;  %p214_p8 = scmp.lt.s32.totalorder %s870_s24, 3 }
   0xc   : > { %p215_p9 = pnand %p741_p7, %p214_p8 }
   0xd   : > { %p243_p10 = scmp.lt.s32.totalorder (!%p215_p9), %s936_s25, 1  ;;  %s240_s26 = sand.u32 (!%p215_p9), 1, %s862_s22  }
   0xe   : > { %218 = sbr.rel (%p215_p9) target bundleno = 408 (0x198), region = 44  ;;  %s755_s29 = sshll.u32 (!%p215_p9), %s936_s25, 3 }
   0xf   : > { %s674_s11 = scalar_lea.hbm (!%p215_p9), %s1108_s6, %s755_s29 }
  0x10   : > { %s678_s16 = sshll.u32 (!%p215_p9), %s674_s11, 4  ;;  %s679_s16 = int_to_ptr.hbm [resolvable:$true] %s678_s16 }
  0x13   : > { %v261_v0 = vld [vmem:[%s1103_s1 + $0x18] sm:$0xff]  ;;  %v260_v2 = vld [vmem:[%s1103_s1 + $0x10] sm:$0xff]  ;;  %v872_v3 = vmov 0   ;;  %s244_s17 = scalar_select %p243_p10, %s936_s25, 1  ;;  %v259_v5 = vld [vmem:[%s1103_s1 + $0x8] sm:$0xff]  ;;  %v250_v12 = vlaneseq  ;;  %vm262_vm0 = vcmask 261120  }
  0x14   : > { %v289_v1 = vld [vmem:[%s1104_s2 + $0x18] sm:$0xff]  ;;  %805 = vset.pattern.permute.xlu0 %v872_v3  ;;  %278 = vmatpush.msra.mxu0 %v261_v0  ;;  %v288_v4 = vld [vmem:[%s1104_s2 + $0x10] sm:$0xff]  ;;  %v287_v6 = vld [vmem:[%s1104_s2 + $0x8] sm:$0xff]  ;;  %v873_v15 = vmov 0.0   ;;  %v874_v31 = vmov 683565275  }
  0x15   : > { %302 = vmatpush.msra.mxu1 %v289_v1  ;;  %s743_s28 = sshll.u32 %s244_s17, 3  ;;  %v258_v10 = vld [vmem:[%s1103_s1] sm:$0xff]  ;;  %v251_v13 = vand.u32 127, %v250_v12  ;;  %v875_v33 = vmov 2475754826   ;;  %s664_s17 = scalar_lea.sflag [#allocation3], %s240_s26 }
  0x16   : > { %279 = vmatpush.msra.mxu0 %v260_v2  ;;  %s246_s10 = scalar_lea.vmem %s1102_s0, %s743_s28  ;;  %v286_v11 = vld [vmem:[%s1104_s2] sm:$0xff]  ;;  %v876_v35 = vmov 2131351028   ;;  %v877_v37 = vmov 2102212464   ;;  %s742_s28 = sshll.u32 %s240_s26, 3 }
  0x17   : > { %303 = vmatpush.msra.mxu1 %v288_v4  ;;  %v247_v7 = vld [vmem:[%s246_s10] sm:$0xff]  ;;  %v878_v42 = vmov 920167782   ;;  %v879_v45 = vmov 1326507024   ;;  %s242_s14 = scalar_lea.vmem [#allocation2], %s742_s28 }
  0x18   : > { %280 = vmatpush.msra.mxu0 %v259_v5  ;;  %253 = vperm.xlu0 %805, %v247_v7   ;;  %v248_v8 = vcvt.s32.f32 %v247_v7  ;;  %v806_v17 = vld [vmem:[%s1105_s3] ss:$0 sm:$0xff]  ;;  %s676_s15 = sshll.u32 %s242_s14, 4  ;;  %s822_s25 = sshra.s32 %s679_s16, 4  ;;  %s677_s15 = int_to_ptr.vmem [resolvable:$true] %s676_s15  ;;  %s823_s25 = int_to_ptr.hbm [resolvable:$true] %s822_s25 }
  0x19   : > { %304 = vmatpush.msra.mxu1 %v287_v6  ;;  %s824_s18 = scalar_lea.hbm %s823_s25, 8  ;;  %s828_s28 = scalar_lea.hbm %s1108_s6, 16 }
  0x1a   : > { %v249_v9 = vmul.f32 0.19634955, %v248_v8  ;;  %281 = vmatpush.msra.mxu0 %v258_v10  ;;  %p825_p11 = scmp.ne.s32.totalorder %s823_s25, %s824_s18  ;;  %p829_p0 = scmp.lt.s32.totalorder %s823_s25, %s1108_s6 }
  0x1b   : > { %305 = vmatpush.msra.mxu1 %v286_v11  ;;  %p830_p1 = scmp.lt.s32.totalorder %s828_s28, %s824_s18 }
  0x1c   : > { %p826_p12 = pnand %p825_p11, %p953_p5 }
  0x1d   : > { %p831_p2 = por %p830_p1, %p829_p0 }
  0x1e   : > { %p827_p13 = pneg %p826_p12 }
  0x20   : > { %313 = vperm.xlu0 %805, %v249_v9   ;;  %p832_p3 = pnand %p831_p2, %p827_p13 }
  0x8a   : > { %v254_v14 = vpop.permute.xlu0 %253 }
  0x8b   : > { %vm255_vm1 = vcmp.eq.s32.totalorder %v251_v13, %v254_v14 }
  0x8c   : > { %v744_v16 = vsel %vm255_vm1, 1.0, %v873_v15 }
  0x8d   : > { %745 = vmatmul.msk.f32.vlgmr.msra.gmra.mxu0 %vm262_vm0, %v744_v16  ;;  %746 = vmatmul.msk.f32.vlgmr.msra.gmra.mxu1 %vm262_vm0, %v744_v16 }
  0x92   : > { %v314_v18 = vpop.permute.xlu0 %313 }
  0x93   : > { %v998_v19 = vmul.f32 %v806_v17, %v314_v18 }
  0x95   : > { %v323_v20 = vand.u32 2139095040, %v998_v19  ;;  %v320_v22 = vand.u32 2147483647, %v998_v19  ;;  %vm322_vm14 = vcmp.lt.s32.totalorder %v998_v19, 0 }
  0x97   : > { %v324_v21 = vshrl.u32 %v323_v20, 23  ;;  %v327_v25 = vand.u32 8388607, %v320_v22  ;;  %vm1046_vm15 = vcmp.le.f32.partialorder %v320_v22, 0.7853982  ;;  %v632_v22 = vld [vmem:[%s1106_s4] sm:$0xff] }
  0x99   : > { %v747_v23 = vadd.s32 4294967169, %v324_v21  ;;  %v328_v28 = vor.u32 8388608, %v327_v25 }
  0x9b   : > { %v330_v24 = vadd.s32 1, %v747_v23  ;;  %v1006_v47 = vshll.u32 %v328_v28, 8 }
  0x9d   : > { %vm331_vm2 = vcmp.gt.s32.totalorder %v330_v24, 0  ;;  %v369_v59 = vand.u32 65535, %v1006_v47  ;;  %v370_v61 = vshrl.u32 %v1006_v47, 16 }
  0x9e   : > { %v332_v26 = vsel %vm331_vm2, %v330_v24, 0 }
  0x9f   : > { %v334_v27 = vand.u32 31, %v332_v26  ;;  %v1004_v29 = vshrl.u32 %v332_v26, 5 }
  0xa1   : > { %v335_v30 = vsub.s32 32, %v334_v27  ;;  %v337_v32 = vshll.u32 %v874_v31, %v334_v27  ;;  %v340_v34 = vshll.u32 %v875_v33, %v334_v27  ;;  %v343_v36 = vshll.u32 %v876_v35, %v334_v27 }
  0xa2   : > { %v346_v38 = vshll.u32 %v877_v37, %v334_v27  ;;  %v349_v44 = vshll.u32 %v878_v42, %v334_v27  ;;  %vm352_vm3 = vcmp.lt.s32.totalorder %v1004_v29, 1  ;;  %vm355_vm4 = vcmp.lt.s32.totalorder %v1004_v29, 4 }
  0xa3   : > { %v338_v39 = vshrl.u32 %v875_v33, %v335_v30  ;;  %v341_v40 = vshrl.u32 %v876_v35, %v335_v30  ;;  %v344_v41 = vshrl.u32 %v877_v37, %v335_v30  ;;  %v347_v43 = vshrl.u32 %v878_v42, %v335_v30 }
  0xa4   : > { %v350_v46 = vshrl.u32 %v879_v45, %v335_v30  ;;  %vm354_vm5 = vcmp.lt.s32.totalorder %v1004_v29, 3  ;;  %vm353_vm6 = vcmp.lt.s32.totalorder %v1004_v29, 2  ;;  %v336_v24 = vshrl.u32 %v874_v31, %v335_v30 }
  0xa5   : > { %v339_v48 = vor.u32 %v338_v39, %v337_v32  ;;  %v342_v49 = vor.u32 %v341_v40, %v340_v34  ;;  %v345_v50 = vor.u32 %v344_v41, %v343_v36  ;;  %v348_v51 = vor.u32 %v347_v43, %v346_v38 }
  0xa6   : > { %v351_v52 = vor.u32 %v350_v46, %v349_v44 }
  0xa7   : > { %v360_v53 = vsel %vm352_vm3, %v339_v48, %v342_v49  ;;  %v361_v54 = vsel %vm355_vm4, %v348_v51, 920167782  ;;  %v364_v55 = vsel %vm352_vm3, %v342_v49, %v345_v50  ;;  %v357_v20 = vsel %vm355_vm4, %v345_v50, 2102212464 }
  0xa8   : > { %v362_v56 = vsel %vm354_vm5, %v345_v50, %v361_v54  ;;  %v365_v57 = vsel %vm355_vm4, %v351_v52, 1326507024  ;;  %v356_v33 = vsel %vm352_vm3, %v336_v24, %v339_v48  ;;  %v358_v34 = vsel %vm354_vm5, %v342_v49, %v357_v20 }
  0xa9   : > { %v366_v58 = vsel %vm354_vm5, %v348_v51, %v365_v57  ;;  %v363_v60 = vsel %vm353_vm6, %v360_v53, %v362_v56  ;;  %v359_v31 = vsel %vm353_vm6, %v356_v33, %v358_v34 }
  0xaa   : > { %v367_v62 = vsel %vm353_vm6, %v364_v55, %v366_v58  ;;  %v393_v63 = vand.u32 65535, %v363_v60  ;;  %v394_v0 = vshrl.u32 %v363_v60, 16  ;;  %v413_v43 = vmul.u32 %v1006_v47, %v359_v31 }
  0xab   : > { %v371_v1 = vand.u32 65535, %v367_v62  ;;  %v372_v2 = vshrl.u32 %v367_v62, 16 }
  0xac   : > { %v396_v4 = vmul.u32 %v394_v0, %v369_v59  ;;  %v397_v5 = vmul.u32 %v393_v63, %v370_v61  ;;  %v395_v8 = vmul.u32 %v393_v63, %v369_v59  ;;  %v398_v12 = vmul.u32 %v394_v0, %v370_v61 }
  0xad   : > { %v374_v6 = vmul.u32 %v372_v2, %v369_v59  ;;  %v375_v7 = vmul.u32 %v371_v1, %v370_v61  ;;  %v373_v10 = vmul.u32 %v371_v1, %v369_v59  ;;  %v376_v13 = vmul.u32 %v372_v2, %v370_v61 }
  0xae   : > { %v399_v9 = vshll.u32 %v396_v4, 16  ;;  %v401_v14 = vshll.u32 %v397_v5, 16  ;;  %v400_v28 = vshrl.u32 %v396_v4, 16  ;;  %v402_v37 = vshrl.u32 %v397_v5, 16 }
  0xaf   : > { %v377_v11 = vshll.u32 %v374_v6, 16  ;;  %v379_v16 = vshll.u32 %v375_v7, 16  ;;  %v378_v35 = vshrl.u32 %v374_v6, 16  ;;  %v380_v39 = vshrl.u32 %v375_v7, 16 }
  0xb0   : > { %vm403_vm7 = vc.u32 %v395_v8, %v399_v9  ;;  %v405_v15 = vadd.s32 %v399_v9, %v395_v8 }
  0xb1   : > { %vm381_vm8 = vc.u32 %v373_v10, %v377_v11  ;;  %v383_v17 = vadd.s32 %v377_v11, %v373_v10  ;;  %v404_v18 = vsel %vm403_vm7, 1, %v872_v3  ;;  %vm463_vm7 = vweird.f32 %v998_v19 }
  0xb2   : > { %v382_v21 = vsel %vm381_vm8, 1, %v872_v3  ;;  %v406_v23 = vadd.s32 %v404_v18, %v398_v12  ;;  %vm407_vm9 = vc.u32 %v405_v15, %v401_v14  ;;  %v633_v12 = vld [vmem:[%s1106_s4 + $0x8] sm:$0xff]  ;;  %vm638_vm8 = vcmask 130048  }
  0xb3   : > { %v384_v25 = vadd.s32 %v382_v21, %v376_v13  ;;  %vm385_vm10 = vc.u32 %v383_v17, %v379_v16  ;;  %v408_v26 = vsel %vm407_vm9, 1, %v872_v3  ;;  %656 = vmatpush.msra.mxu2 %v633_v12 }
  0xb4   : > { %v386_v27 = vsel %vm385_vm10, 1, %v872_v3  ;;  %v410_v32 = vadd.s32 %v408_v26, %v406_v23  ;;  %v409_v3 = vadd.s32 %v405_v15, %v401_v14 }
  0xb5   : > { %v388_v36 = vadd.s32 %v386_v27, %v384_v25  ;;  %657 = vmatpush.msra.mxu2 %v632_v22 }
  0xb6   : > { %v411_v38 = vadd.s32 %v410_v32, %v400_v28 }
  0xb7   : > { %v389_v30 = vadd.s32 %v388_v36, %v378_v35 }
  0xb8   : > { %v412_v40 = vadd.s32 %v411_v38, %v402_v37 }
  0xb9   : > { %v390_v41 = vadd.s32 %v389_v30, %v380_v39 }
  0xba   : > { %v416_v42 = vadd.s32 1, %v412_v40 }
  0xbb   : > { %vm415_vm11 = vc.u32 %v390_v41, %v409_v3  ;;  %v414_v55 = vadd.s32 %v409_v3, %v390_v41 }
  0xbc   : > { %v417_v44 = vsel %vm415_vm11, %v416_v42, %v412_v40 }
  0xbd   : > { %v418_v45 = vadd.s32 %v417_v44, %v413_v43 }
  0xbf   : > { %v419_v46 = vadd.s32 536870912, %v418_v45 }
  0xc1   : > { %v420_v48 = vshrl.u32 %v419_v46, 30 }
  0xc3   : > { %v421_v49 = vshll.u32 %v420_v48, 30  ;;  %v444_v15 = vsub.s32 4, %v420_v48 }
  0xc5   : > { %v422_v50 = vsub.s32 %v418_v45, %v421_v49  ;;  %v445_v18 = vsel %vm322_vm14, %v444_v15, %v420_v48 }
  0xc6   : > { %v447_v21 = vsel %vm1046_vm15, 0, %v445_v18 }
  0xc7   : > { %vm423_vm12 = vcmp.lt.s32.totalorder %v422_v50, 0  ;;  %v424_v51 = vsub.s32 0, %v422_v50  ;;  %v619_v25 = vadd.s32 3, %v447_v21  ;;  %v464_v28 = vand.u32 3, %v447_v21 }
  0xc9   : > { %v425_v52 = vsel %vm423_vm12, %v424_v51, %v422_v50  ;;  %v620_v32 = vand.u32 3, %v619_v25  ;;  %vm466_vm1 = vcmp.eq.s32.totalorder %v464_v28, 0  ;;  %vm469_vm3 = vcmp.eq.s32.totalorder %v464_v28, 2 }
  0xca   : > { %v426_v53 = vclz %v425_v52  ;;  %vm465_vm5 = vcmp.lt.s32.totalorder %v464_v28, 2 }
  0xcb   : > { %vm622_vm2 = vcmp.eq.s32.totalorder %v620_v32, 0  ;;  %vm625_vm4 = vcmp.eq.s32.totalorder %v620_v32, 2  ;;  %vm621_vm6 = vcmp.lt.s32.totalorder %v620_v32, 2 }
  0xcc   : > { %v748_v54 = vadd.s32 4294967294, %v426_v53 }
  0xce   : > { %vm749_vm13 = vcmp.lt.s32.totalorder %v748_v54, 0 }
  0xcf   : > { %v429_v29 = vsel %vm749_vm13, 0, %v748_v54 }
  0xd0   : > { %v430_v56 = vsub.s32 32, %v429_v29  ;;  %v434_v57 = vsub.s32 4294967266, %v429_v29  ;;  %v431_v58 = vshll.u32 %v422_v50, %v429_v29 }
  0xd2   : > { %v432_v59 = vshrl.u32 %v414_v55, %v430_v56  ;;  %v435_v47 = vadd.s32 127, %v434_v57 }
  0xd4   : > { %v433_v60 = vor.u32 %v432_v59, %v431_v58  ;;  %v436_v61 = vshll.u32 %v435_v47, 23 }
  0xd6   : > { %v437_v62 = vor.u32 4788187, %v436_v61  ;;  %v440_v0 = vcvt.s32.f32 %v433_v60 }
  0xd8   : > { %v438_v63 = vand.u32 2147483647, %v437_v62 }
  0xda   : > { %v441_v1 = vmul.f32 %v440_v0, %v438_v63 }
  0xdc   : > { %v442_v2 = vxor.u32 2147483648, %v441_v1 }
  0xde   : > { %v443_v5 = vsel %vm322_vm14, %v442_v2, %v441_v1 }
  0xdf   : > { %v446_v6 = vsel %vm1046_vm15, %v998_v19, %v443_v5  ;;  %v807_v19 = vld [vmem:[%s1107_s5] ss:$0 sm:$0xff] }
  0xe0   : > { %v448_v7 = vmul.f32 %v446_v6, %v446_v6 }
  0xe2   : > { %v456_v8 = vmul.f32 -0.00019511016, %v448_v7  ;;  %v449_v10 = vmul.f32 -0.001358992, %v448_v7 }
  0xe4   : > { %v457_v9 = vadd.f32 0.008332121, %v456_v8  ;;  %v450_v13 = vadd.f32 0.041655596, %v449_v10 }
  0xe6   : > { %v458_v11 = vmul.f32 %v457_v9, %v448_v7  ;;  %v451_v16 = vmul.f32 %v450_v13, %v448_v7 }
  0xe8   : > { %v459_v14 = vadd.f32 -0.16666654, %v458_v11  ;;  %v452_v20 = vadd.f32 -0.4999988, %v451_v16 }
  0xea   : > { %v460_v17 = vmul.f32 %v459_v14, %v448_v7  ;;  %v453_v24 = vmul.f32 %v452_v20, %v448_v7 }
  0xec   : > { %v461_v23 = vadd.f32 1.0, %v460_v17  ;;  %v454_v27 = vadd.f32 1.0, %v453_v24 }
  0xee   : > { %v462_v26 = vmul.f32 %v461_v23, %v446_v6  ;;  %v470_v34 = vxor.u32 2147483648, %v454_v27 }
  0xf0   : > { %v467_v33 = vxor.u32 2147483648, %v462_v26  ;;  %v471_v37 = vsel %vm469_vm3, %v470_v34, %v462_v26  ;;  %v627_v38 = vsel %vm625_vm4, %v470_v34, %v462_v26 }
  0xf2   : > { %v468_v35 = vsel %vm466_vm1, %v454_v27, %v467_v33  ;;  %v624_v36 = vsel %vm622_vm2, %v454_v27, %v467_v33 }
  0xf3   : > { %v472_v39 = vsel %vm465_vm5, %v468_v35, %v471_v37  ;;  %v628_v30 = vsel %vm621_vm6, %v624_v36, %v627_v38 }
  0xf4   : > { %v473_v40 = vsel %vm463_vm7, nan, %v472_v39  ;;  %v629_v3 = vsel %vm463_vm7, nan, %v628_v30 }
 0x10a   : > { %v283_v31 = vpop.f32.mrf.mxu0  ;;  %v307_v41 = vpop.f32.mrf.mxu1 }
 0x10b   : > { %v474_v42 = vmul.f32 %v473_v40, %v283_v31  ;;  %v630_v43 = vmul.f32 %v629_v3, %v307_v41 }
 0x10d   : > { %v631_v44 = vadd.f32 %v630_v43, %v474_v42 }
 0x10f   : > { %753 = vmatmul.msk.f32.vlgmr.msra.gmra.mxu2 %vm638_vm8, %v631_v44 }
 0x192   : > { %v659_v45 = vpop.f32.mrf.mxu2 }
 0x193   : > { %v660_v46 = vadd.f32 %v807_v19, %v659_v45 }
 0x195   : > { %662 = vst.msk [vmem:[%s242_s14] sm:$0xff] %vm262_vm0, %v660_v46 }
 0x196   : > { %835 = shalt.err (!%p832_p3)
}
 0x197   : > { %758 = dma.vmem_to_hbm [thread:$0]  (%p953_p5), %s677_s15, 128, %s679_s16, %s664_s17  }
 0x198 PF: > { %p764_p4 = scmp.ge.s32.totalorder %s870_s24, 2  ;;  %s690_s26 = sand.u32 1, %s858_s21  }
 0x199   : > { %s691_s10 = scalar_lea.sflag [#allocation3], %s690_s26 }
 0x19a   : > { %p761_p7 = pnand %p764_p4, %p957_p6 }
 0x19c   : > { %p762_p8 = pneg %p761_p7 }
 0x19e   : > { %853 = dma.done.wait (%p762_p8), %s691_s10, 128  }
 0x19f   : > { %855 = vsyncadd (%p762_p8), %s691_s10, 4294967168  ;;  %p16_p9 = scmp.ge.s32.totalorder %s940_s27, 4   ;;  %s1113_s21 = smov %s862_s22 }
 0x1a0   : > { %s1114_s22 = smov %s866_s23  ;;  %s1115_s23 = smov %s951_s30 }
 0x1a1   : > { %s1116_s24 = smov %s940_s27  ;;  %18 = sbr.rel (!%p16_p9) target bundleno = 3 (0x3), region = 79 }
 0x1a6   :  { %697 = vsyncpa [#allocation3], 1 }
 0x1a7   :  { %699 = vsyncpa [#allocation3 + $0x1], 1 }

</bundles_post_ra>
